<compile_context>
chip_gen: v7x
topology: tpu7x:2x2x1
jax: 0.10.0
libtpu: 0.0.40
codegen_flags: <defaults>
</compile_context>

<pallas_src>
import jax
import jax.numpy as jnp
from jax.experimental import pallas as pl
from jax.experimental.pallas import tpu as pltpu

_LANES = 512            # lane-dense last dim (multiple of 128)
_MAX_TILE_ROWS = 1024   # (1024, 512) f32 tile = 2 MiB per input per buffer


def _sse_kernel(o_ref, t_ref, part_ref):
    o = o_ref[...].astype(jnp.float32)
    t = t_ref[...].astype(jnp.float32)
    d = o - t
    sse = jnp.sum(d * d)
    part_ref[...] = jnp.broadcast_to(sse, part_ref.shape)


def _sse_weighted_kernel(o_ref, t_ref, w_ref, part_ref):
    o = o_ref[...].astype(jnp.float32)
    t = t_ref[...].astype(jnp.float32)
    w = w_ref[...].astype(jnp.float32)
    d = (o - t) * w
    sse = jnp.sum(d * d)
    part_ref[...] = jnp.broadcast_to(sse, part_ref.shape)


def mse_loss(output, target, target_weight=None, *, use_target_weight=False,
             loss_weight=1.0, max_tile_rows=_MAX_TILE_ROWS):
    """Pallas equivalent of MSELoss.forward.

    Args:
      output:        [N, K, 2]
      target:        [N, K, 2]
      target_weight: [N, K, 2] (only required when use_target_weight=True)
    Returns:
      scalar float32 loss = mean(((o[*w]) - (t[*w]))**2) * loss_weight
    """
    assert output.shape == target.shape
    if use_target_weight:
        assert target_weight is not None and target_weight.shape == output.shape
    assert max_tile_rows % 8 == 0

    total = 1
    for s in output.shape:
        total *= s

    rows = pl.cdiv(total, _LANES)
    if rows <= max_tile_rows:
        tm = rows                       # single tile: block rows == full dim
        padded_rows = rows
    else:
        tm = max_tile_rows              # multiple of 8
        padded_rows = pl.cdiv(rows, tm) * tm
    num_tiles = padded_rows // tm
    padded_total = padded_rows * _LANES

    def prep(x):
        flat = x.reshape(-1)
        if padded_total > total:
            # Zero padding contributes exactly 0 to the SSE in both the
            # weighted ((0-0)*0) and unweighted (0-0) paths.
            flat = jnp.pad(flat, (0, padded_total - total))
        return flat.reshape(padded_rows, _LANES)

    in_spec = pl.BlockSpec((tm, _LANES), lambda i: (i, 0))
    out_spec = pl.BlockSpec((8, 128), lambda i: (i, 0))

    if use_target_weight:
        kernel = _sse_weighted_kernel
        args = (prep(output), prep(target), prep(target_weight))
        in_specs = [in_spec, in_spec, in_spec]
    else:
        kernel = _sse_kernel
        args = (prep(output), prep(target))
        in_specs = [in_spec, in_spec]

    partials = pl.pallas_call(
        kernel,
        out_shape=jax.ShapeDtypeStruct((num_tiles * 8, 128), jnp.float32),
        grid_spec=pltpu.PrefetchScalarGridSpec(
            num_scalar_prefetch=0,
            grid=(num_tiles,),
            in_specs=in_specs,
            out_specs=out_spec,
        ),
        compiler_params=pltpu.CompilerParams(
            dimension_semantics=("parallel",),
            vmem_limit_bytes=32 * 1024 * 1024,
        ),
    )(*args)

    # Each (8,128) output block holds that tile's SSE broadcast; take one
    # element per tile, sum, and apply the precomputed scale exactly once.
    per_tile_sse = partials.reshape(num_tiles, 8, 128)[:, 0, 0]
    scale = float(loss_weight) / float(total)
    return jnp.sum(per_tile_sse) * jnp.float32(scale)


def mse_loss_ref(output, target, target_weight, *, use_target_weight=False, loss_weight=1.0):
    """Pure-JAX reference mirroring the PyTorch module."""
    if use_target_weight:
        loss = jnp.mean(((output * target_weight) - (target * target_weight)) ** 2)
    else:
        loss = jnp.mean((output - target) ** 2)
    return loss * loss_weight


if __name__ == "__main__":
    key = jax.random.PRNGKey(0)
    k1, k2, k3 = jax.random.split(key, 3)

    ok = True

    # Case 1: small shapes matching the module spec (N=2, K=17, coords=2).
    N, K = 2, 17
    output = jax.random.normal(k1, (N, K, 2), dtype=jnp.float32)
    target = jax.random.normal(k2, (N, K, 2), dtype=jnp.float32)
    target_weight = (jax.random.uniform(k3, (N, K, 1), dtype=jnp.float32) > 0.2).astype(
        jnp.float32
    ) * jnp.ones((N, K, 2), dtype=jnp.float32)

    for use_tw, lw in [(False, 1.0), (True, 1.0), (True, 0.5)]:
        got = jax.block_until_ready(
            mse_loss(output, target, target_weight, use_target_weight=use_tw, loss_weight=lw)
        )
        want = mse_loss_ref(
            output, target, target_weight, use_target_weight=use_tw, loss_weight=lw
        )
        if not jnp.allclose(got, want, rtol=1e-5, atol=1e-6):
            ok = False
            print(f"MISMATCH use_tw={use_tw} lw={lw}: {got} vs {want}")

    # Case 2: exercise the multi-tile (grid > 1) + padding path with a small
    # max_tile_rows so it stays cheap.
    k4, k5, k6 = jax.random.split(jax.random.PRNGKey(1), 3)
    N2, K2 = 128, 17
    o2 = jax.random.normal(k4, (N2, K2, 2), dtype=jnp.float32)
    t2 = jax.random.normal(k5, (N2, K2, 2), dtype=jnp.float32)
    w2 = (jax.random.uniform(k6, (N2, K2, 1), dtype=jnp.float32) > 0.2).astype(
        jnp.float32
    ) * jnp.ones((N2, K2, 2), dtype=jnp.float32)

    for use_tw, lw in [(False, 1.0), (True, 0.25)]:
        got = jax.block_until_ready(
            mse_loss(o2, t2, w2, use_target_weight=use_tw, loss_weight=lw, max_tile_rows=8)
        )
        want = mse_loss_ref(o2, t2, w2, use_target_weight=use_tw, loss_weight=lw)
        if not jnp.allclose(got, want, rtol=1e-5, atol=1e-6):
            ok = False
            print(f"MISMATCH (multi-tile) use_tw={use_tw} lw={lw}: {got} vs {want}")

    if ok:
        print("KERNEL_OK")
</pallas_src>

<mosaic_0001>
module attributes {stable_mosaic.version = 11 : i64} {
  func.func @_sse_kernel(%arg0: i32, %arg1: memref<1x512xf32, #tpu.memory_space<vmem>>, %arg2: memref<1x512xf32, #tpu.memory_space<vmem>>, %arg3: memref<8x128xf32, #tpu.memory_space<vmem>>) attributes {dimension_semantics = [#tpu.dimension_semantics<parallel>], iteration_bounds = array<i64: 1>, scalar_prefetch = 0 : i64, scratch_operands = 0 : i64, tpu.core_type = #tpu.core_type<tc>, window_params = [{transform_indices = @transform_0, window_bounds = array<i64: 1, 512>}, {transform_indices = @transform_1, window_bounds = array<i64: 1, 512>}, {transform_indices = @transform_2, window_bounds = array<i64: 8, 128>}]} {
    %c0 = arith.constant 0 : index
    %c0_0 = arith.constant 0 : index
    %0 = vector.load %arg1[%c0, %c0_0] : memref<1x512xf32, #tpu.memory_space<vmem>>, vector<1x512xf32>
    %c0_1 = arith.constant 0 : index
    %c0_2 = arith.constant 0 : index
    %1 = vector.load %arg2[%c0_1, %c0_2] : memref<1x512xf32, #tpu.memory_space<vmem>>, vector<1x512xf32>
    %2 = arith.subf %0, %1 : vector<1x512xf32>
    %3 = arith.mulf %2, %2 : vector<1x512xf32>
    %4 = vector.shape_cast %3 : vector<1x512xf32> to vector<1x1x512xf32>
    %cst = arith.constant dense<0.000000e+00> : vector<1xf32>
    %5 = vector.multi_reduction <add>, %4, %cst [1, 2] : vector<1x1x512xf32> to vector<1xf32>
    %6 = vector.shape_cast %5 : vector<1xf32> to vector<1x1x1xf32>
    %7 = vector.extract %6[0, 0, 0] : f32 from vector<1x1x1xf32>
    %8 = vector.broadcast %7 : f32 to vector<8x128xf32>
    %c0_3 = arith.constant 0 : index
    %c0_4 = arith.constant 0 : index
    %9 = vector.load %arg3[%c0_3, %c0_4] : memref<8x128xf32, #tpu.memory_space<vmem>>, vector<8x128xf32>
    tpu.vector_store %arg3[%c0_3, %c0_4], %8 {strides = array<i32>} : memref<8x128xf32, #tpu.memory_space<vmem>>, vector<8x128xf32>,
    return
  }
  func.func @transform_0(%arg0: i32) -> (i32, i32) {
    %c0_i32 = arith.constant 0 : i32
    %c0_i32_0 = arith.constant 0 : i32
    return %arg0, %c0_i32 : i32, i32
  }
  func.func @transform_1(%arg0: i32) -> (i32, i32) {
    %c0_i32 = arith.constant 0 : i32
    %c0_i32_0 = arith.constant 0 : i32
    return %arg0, %c0_i32 : i32, i32
  }
  func.func @transform_2(%arg0: i32) -> (i32, i32) {
    %c0_i32 = arith.constant 0 : i32
    %c0_i32_0 = arith.constant 0 : i32
    return %arg0, %c0_i32 : i32, i32
  }
}

</mosaic_0001>

<bundles_post_ra>
// kernel: tpu_custom_call.1
= control target key start
LH: loop header
LB: loop body
LE: loop exit
PB: predicated region body
PF: predicated region fallthrough
CT: control target
= control target key end

     0   :  { %7 = vsyncpa [#allocation3], 0  ;;  %s227_s0 = inlined_call_operand.hbm [shape: f32[1,512], index: 0, kind: input, shape index: {}]   ;;  %s228_s1 = inlined_call_operand.hbm [shape: f32[1,512], index: 1, kind: input, shape index: {}]   ;;  %s229_s2 = inlined_call_operand.hbm [shape: f32[8,128], index: 2, kind: output, shape index: {}]  }
   0x1   :  { %8 = vsyncpa [#allocation6], 0 }
   0x2   :  { %9 = vsyncpa [#allocation4], 0  ;;  %s173_s9 = smov [#allocation2]   ;;  %s174_s11 = smov [#allocation5]  }
   0x3   :  { %s16_s10 = sshll.u32 %s173_s9, 4  ;;  %s26_s12 = sshll.u32 %s174_s11, 4  ;;  %s17_s10 = int_to_ptr.vmem [resolvable:$true] %s16_s10  ;;  %s27_s12 = int_to_ptr.vmem [resolvable:$true] %s26_s12 }
   0x4   :  { %s101_s15 = scalar_lea.hbm %s227_s0, 64 }
   0x5   :  { %p102_p0 = scmp.ne.s32.totalorder %s227_s0, %s101_s15  ;;  %p105_p1 = scmp.lt.u32.totalorder %s101_s15, %s227_s0 }
   0x7   :  { %p107_p2 = pnand %p105_p1, %p102_p0 }
   0x9   :  { %110 = shalt.err (!%p107_p2)
}
   0xa   :  { %s111_s20 = scalar_lea.vmem %s17_s10, 64  ;;  %p116_p4 = scmp.lt.s32.totalorder %s17_s10, %s17_s10 }
   0xb   :  { %p112_p3 = scmp.ne.s32.totalorder %s17_s10, %s111_s20  ;;  %p117_p5 = scmp.lt.s32.totalorder %s111_s20, %s111_s20 }
   0xd   :  { %p118_p6 = por %p117_p5, %p116_p4 }
   0xf   :  { %p119_p7 = pnand %p118_p6, %p112_p3 }
  0x11   :  { %122 = shalt.err (!%p119_p7)
}
  0x12   :  { %19 = dma.hbm_to_vmem [thread:$0]  %s227_s0, 64, %s17_s10, [#allocation3]  }
  0x13   :  { %s123_s25 = scalar_lea.hbm %s228_s1, 64 }
  0x14   :  { %p124_p8 = scmp.ne.s32.totalorder %s228_s1, %s123_s25  ;;  %p127_p9 = scmp.lt.u32.totalorder %s123_s25, %s228_s1 }
  0x16   :  { %p129_p10 = pnand %p127_p9, %p124_p8 }
  0x18   :  { %132 = shalt.err (!%p129_p10)
}
  0x19   :  { %s133_s30 = scalar_lea.vmem %s27_s12, 64  ;;  %p138_p12 = scmp.lt.s32.totalorder %s27_s12, %s27_s12 }
  0x1a   :  { %p134_p11 = scmp.ne.s32.totalorder %s27_s12, %s133_s30  ;;  %p139_p13 = scmp.lt.s32.totalorder %s133_s30, %s133_s30 }
  0x1c   :  { %p140_p0 = por %p139_p13, %p138_p12 }
  0x1e   :  { %p141_p1 = pnand %p140_p0, %p134_p11 }
  0x20   :  { %144 = shalt.err (!%p141_p1)
}
  0x21   :  { %29 = dma.hbm_to_vmem [thread:$0]  %s228_s1, 64, %s27_s12, [#allocation6]  }
  0x22   :  { %167 = dma.done.wait [#allocation3], 64  }
  0x23   :  { %168 = vsyncadd [#allocation3], 4294967232 }
  0x24   :  { %169 = dma.done.wait [#allocation6], 64  }
  0x25   :  { %170 = vsyncadd [#allocation6], 4294967232  ;;  %v41_v0 = vlaneseq  ;;  %v36_v2 = vld [vmem:[#allocation2] sm:$0xf]  ;;  %v37_v3 = vld [vmem:[#allocation5] sm:$0xf] }
  0x26   :  { %v38_v5 = vsub.f32 %v36_v2, %v37_v3  ;;  %vm61_vm0 = vcmask 1040384   ;;  %s175_s1 = smov [#allocation7]  }
  0x27   :  { %v42_v1 = vshrl.u32 %v41_v0, 7  ;;  %s86_s4 = sshll.u32 %s175_s1, 4  ;;  %s87_s4 = int_to_ptr.vmem [resolvable:$true] %s86_s4 }
  0x28   :  { %v39_v9 = vmul.f32 %v38_v5, %v38_v5  ;;  %s145_s6 = scalar_lea.vmem %s87_s4, 128  ;;  %p150_p3 = scmp.lt.s32.totalorder %s87_s4, %s87_s4 }
  0x29   :  { %v43_v4 = vsub.s32 0, %v42_v1  ;;  %v47_v6 = vsub.s32 1, %v42_v1  ;;  %v51_v7 = vsub.s32 2, %v42_v1  ;;  %v55_v8 = vsub.s32 3, %v42_v1  ;;  %p146_p2 = scmp.ne.s32.totalorder %s87_s4, %s145_s6  ;;  %p151_p4 = scmp.lt.s32.totalorder %s145_s6, %s145_s6 }
  0x2b   :  { %v44_v10 = vrot.slane %v39_v9, %v43_v4  ;;  %v48_v11 = vrot.slane %v39_v9, %v47_v6  ;;  %v52_v12 = vrot.slane %v39_v9, %v51_v7  ;;  %v56_v13 = vrot.slane %v39_v9, %v55_v8  ;;  %p152_p5 = por %p151_p4, %p150_p3 }
  0x2d   :  { %v62_v14 = vsel %vm61_vm0, %v44_v10, 0.0  ;;  %v63_v15 = vsel %vm61_vm0, %v48_v11, 0.0  ;;  %v65_v16 = vsel %vm61_vm0, %v52_v12, 0.0  ;;  %v67_v18 = vsel %vm61_vm0, %v56_v13, 0.0  ;;  %p153_p6 = pnand %p152_p5, %p146_p2 }
  0x2e   :  { %v64_v17 = vadd.f32 %v63_v15, %v62_v14 }
  0x30   :  { %v66_v19 = vadd.f32 %v65_v16, %v64_v17 }
  0x32   :  { %v68_v20 = vadd.f32 %v67_v18, %v66_v19 }
  0x34   :  { %69 = vadd.xlane.f32.xlu0 %v68_v20 }
  0xc1   :  { %v70_v21 = vpop.xlane.xlu0 %69 }
  0xc2   :  { %v71_v22 = vrot.slane %v70_v21, 4 }
  0xc4   :  { %v72_v23 = vadd.f32 %v71_v22, %v70_v21 }
  0xc6   :  { %v73_v24 = vrot.slane %v72_v23, 2 }
  0xc8   :  { %v74_v25 = vadd.f32 %v73_v24, %v72_v23 }
  0xca   :  { %v75_v26 = vrot.slane %v74_v25, 1 }
  0xcc   :  { %v76_v27 = vadd.f32 %v75_v26, %v74_v25 }
  0xce   :  { %96 = vpush %v76_v27 }
  0xff   :  { %s97_s5 = spop %96 }
 0x100   :  { %v78_v28 = vstv %s97_s5 }
 0x101   :  { %79 = vst [vmem:[#allocation7] sm:$0xff] %v78_v28 }
 0x102   :  { %156 = shalt.err (!%p153_p6)
}
 0x103   :  { %s157_s9 = scalar_lea.hbm %s229_s2, 128 }
 0x104   :  { %p158_p7 = scmp.ne.s32.totalorder %s229_s2, %s157_s9  ;;  %p161_p8 = scmp.lt.u32.totalorder %s157_s9, %s229_s2 }
 0x106   :  { %p163_p9 = pnand %p161_p8, %p158_p7 }
 0x108   :  { %166 = shalt.err (!%p163_p9)
}
 0x109   :  { %89 = dma.vmem_to_hbm [thread:$0]  %s87_s4, 128, %s229_s2, [#allocation4]  }
 0x10a   :  { %171 = dma.done.wait [#allocation4], 128  }
 0x10b   :  { %172 = vsyncadd [#allocation4], 4294967168 }
 0x10c   :  { %93 = vsyncpa [#allocation3], 1 }
 0x10d   :  { %94 = vsyncpa [#allocation6], 1 }
 0x10e   :  { %95 = vsyncpa [#allocation4], 1 }

</bundles_post_ra>
